<compile_context>
chip_gen: v5e
topology: v5e:2x2
jax: 0.10.0
libtpu: 0.0.40
codegen_flags: <defaults>
</compile_context>

<pallas_src>
import jax
import jax.numpy as jnp
from jax import lax
from jax.experimental import pallas as pl
from jax.experimental.pallas import tpu as pltpu

LN_EPS = 1e-5


def _layernorm(h, gamma, beta, axis):
    mu = jnp.mean(h, axis=axis, keepdims=True)
    var = jnp.mean((h - mu) ** 2, axis=axis, keepdims=True)
    return (h - mu) * lax.rsqrt(var + LN_EPS) * gamma + beta


def edge_mlp_kernel(eidx_ref,   # (2, T) int32          edge indices (frm, to)
                    eat_ref,    # (in_edge_dim, T)      edge attrs, feature-major
                    proj_ref,   # (hid, 2*N)            [(x @ W1_frm)^T | (x @ W1_to)^T]
                    w1c_ref,    # (hid, in_edge_dim)    W1_edge^T
                    w2_ref,     # (hid, hid)            W2^T
                    w3_ref,     # (out_dim, hid)        W3^T
                    vec_ref,    # (rows, 7)             [b1 g1 be1 b2 g2 be2 b3]
                    out_ref):   # (out_dim, T)
    two_n = proj_ref.shape[1]
    n_nodes = two_n // 2
    hid = w2_ref.shape[0]
    out_dim = out_ref.shape[0]
    T = eidx_ref.shape[1]

    idx = eidx_ref[...]
    frm = idx[0:1, :]                       # (1, T)
    to = idx[1:2, :]                        # (1, T)

    # Combined one-hot selector: rows [0, N) pick x[frm], rows [N, 2N) pick x[to].
    ids2 = lax.broadcasted_iota(jnp.int32, (two_n, T), 0)
    oh = ((ids2 == frm) | ((ids2 - n_nodes) == to)).astype(jnp.float32)   # (2N, T)

    vecs = vec_ref[...]                     # (rows, 7)
    b1, g1, be1 = vecs[0:hid, 0:1], vecs[0:hid, 1:2], vecs[0:hid, 2:3]
    b2, g2, be2 = vecs[0:hid, 3:4], vecs[0:hid, 4:5], vecs[0:hid, 5:6]
    b3 = vecs[0:out_dim, 6:7]

    # Layer 1 (fused gather + Linear) + ReLU + LayerNorm (feature axis = sublanes)
    h = (jnp.dot(proj_ref[...], oh, preferred_element_type=jnp.float32)
         + jnp.dot(w1c_ref[...], eat_ref[...], preferred_element_type=jnp.float32)
         + b1)
    h = jnp.maximum(h, 0.0)
    h = _layernorm(h, g1, be1, axis=0)

    # Layer 2 + ReLU + LayerNorm
    h = jnp.dot(w2_ref[...], h, preferred_element_type=jnp.float32) + b2
    h = jnp.maximum(h, 0.0)
    h = _layernorm(h, g2, be2, axis=0)

    # Layer 3 (output projection), lane-dense store
    out = jnp.dot(w3_ref[...], h, preferred_element_type=jnp.float32) + b3
    out_ref[...] = out.astype(out_ref.dtype)


def _round_up(a, m):
    return ((a + m - 1) // m) * m


def edge_conv_forward(params, x, edge_index, edge_attr, *, tile_e=4096):
    """Pallas implementation of EdgeConvModel.forward."""
    if x.ndim == 1:
        x = x[:, None]
    x = x.astype(jnp.float32)

    E = edge_attr.shape[0]
    node_dim = x.shape[1]
    in_edge_dim = edge_attr.shape[1]
    hid = params["w1"].shape[1]
    out_dim = params["w3"].shape[1]
    n_nodes = x.shape[0]

    # --- tiny wrapper-side layout plumbing (node-level / O(1) work, not O(E)) ---
    w1 = params["w1"]
    w1a, w1b, w1c = w1[:node_dim], w1[node_dim:2 * node_dim], w1[2 * node_dim:]
    # Pre-project the node table through layer-1's frm/to row blocks, then pack
    # both halves into one (hid, 2N) table so the kernel does a single matmul.
    proj = jnp.concatenate([(x @ w1a).T, (x @ w1b).T], axis=1)   # (hid, 2N)
    w1cT = w1c.T                             # (hid, in_edge_dim)
    w2T = params["w2"].T                     # (hid, hid)
    w3T = params["w3"].T                     # (out_dim, hid)

    rows = max(hid, out_dim)

    def col(v):
        v = jnp.asarray(v, jnp.float32).reshape(-1)
        return jnp.pad(v, (0, rows - v.shape[0])).reshape(rows, 1)

    vecs = jnp.concatenate(
        [col(params["b1"]), col(params["g1"]), col(params["be1"]),
         col(params["b2"]), col(params["g2"]), col(params["be2"]),
         col(params["b3"])], axis=1)         # (rows, 7)

    eidx = edge_index.astype(jnp.int32)                  # (2, E)   — native layout
    ea_t = edge_attr.astype(jnp.float32).T               # (in_edge_dim, E), lane-major

    # Edges are the lane axis: tiles are multiples of 128 lanes.  Keep >= 2 grid
    # steps so the edge axis shards across both TensorCores on v7x.
    tile = min(int(tile_e), _round_up(max(E // 2, 1), 128))
    tile = max(128, _round_up(tile, 128))
    grid = (pl.cdiv(E, tile),)

    edge_map = lambda i: (0, i)
    const_map = lambda i: (0, 0)

    in_specs = [
        pl.BlockSpec((2, tile), edge_map),               # edge_index tile
        pl.BlockSpec((in_edge_dim, tile), edge_map),     # edge_attr tile (transposed)
        pl.BlockSpec((hid, 2 * n_nodes), const_map),     # packed node projections
        pl.BlockSpec((hid, in_edge_dim), const_map),     # W1_edge^T
        pl.BlockSpec((hid, hid), const_map),             # W2^T
        pl.BlockSpec((out_dim, hid), const_map),         # W3^T
        pl.BlockSpec((rows, 7), const_map),              # packed bias/gamma/beta
    ]
    out_spec = pl.BlockSpec((out_dim, tile), edge_map)

    out_t = pl.pallas_call(
        edge_mlp_kernel,
        out_shape=jax.ShapeDtypeStruct((out_dim, E), jnp.float32),
        grid_spec=pltpu.PrefetchScalarGridSpec(
            num_scalar_prefetch=0,
            grid=grid,
            in_specs=in_specs,
            out_specs=out_spec,
        ),
        compiler_params=pltpu.CompilerParams(
            dimension_semantics=("parallel",)),
    )(eidx, ea_t, proj, w1cT, w2T, w3T, vecs)

    return out_t.T                                        # (E, out_dim)


def init_params(key, node_dim, in_edge_dim, out_edge_dim, hid_dim=16):
    """Deterministic parameter init (same shapes as the torch module)."""
    in_dim = node_dim * 2 + in_edge_dim
    ks = jax.random.split(key, 6)

    def lin(kw, kb, fan_in, fan_out):
        bound = 1.0 / jnp.sqrt(jnp.float32(fan_in))
        w = jax.random.uniform(kw, (fan_in, fan_out), jnp.float32, -bound, bound)
        b = jax.random.uniform(kb, (1, fan_out), jnp.float32, -bound, bound)
        return w, b

    w1, b1 = lin(ks[0], ks[1], in_dim, hid_dim)
    w2, b2 = lin(ks[2], ks[3], hid_dim, hid_dim)
    w3, b3 = lin(ks[4], ks[5], hid_dim, out_edge_dim)
    return {
        "w1": w1, "b1": b1,
        "g1": jnp.ones((1, hid_dim), jnp.float32),
        "be1": jnp.zeros((1, hid_dim), jnp.float32),
        "w2": w2, "b2": b2,
        "g2": jnp.ones((1, hid_dim), jnp.float32),
        "be2": jnp.zeros((1, hid_dim), jnp.float32),
        "w3": w3, "b3": b3,
    }


def reference_forward(params, x, edge_index, edge_attr):
    """Pure-JAX reference (mirrors the torch forward exactly)."""
    if x.ndim == 1:
        x = x[:, None]
    frm, to = edge_index[0], edge_index[1]
    h = jnp.concatenate([x[frm], x[to], edge_attr.astype(jnp.float32)], axis=1)
    h = jnp.maximum(h @ params["w1"] + params["b1"], 0.0)
    h = _layernorm(h, params["g1"], params["be1"], axis=-1)
    h = jnp.maximum(h @ params["w2"] + params["b2"], 0.0)
    h = _layernorm(h, params["g2"], params["be2"], axis=-1)
    return h @ params["w3"] + params["b3"]


if __name__ == "__main__":
    node_dim, in_edge_dim, out_edge_dim, hid_dim = 4, 3, 4, 16
    num_nodes, num_edges = 32, 200

    key = jax.random.PRNGKey(0)
    k_x, k_ei, k_ea, k_p = jax.random.split(key, 4)

    x = jax.random.normal(k_x, (num_nodes, node_dim), jnp.float32)
    edge_index = jax.random.randint(k_ei, (2, num_edges), 0, num_nodes, jnp.int32)
    edge_attr = jax.random.normal(k_ea, (num_edges, in_edge_dim), jnp.float32)

    params = init_params(k_p, node_dim, in_edge_dim, out_edge_dim, hid_dim)

    out = jax.block_until_ready(edge_conv_forward(params, x, edge_index, edge_attr))
    ref = reference_forward(params, x, edge_index, edge_attr)

    assert out.shape == (num_edges, out_edge_dim), out.shape
    max_err = float(jnp.max(jnp.abs(out - ref)))
    assert jnp.allclose(out, ref, atol=1e-4, rtol=1e-4), max_err

    print("KERNEL_OK")
</pallas_src>

<mosaic_0001>
module attributes {stable_mosaic.version = 11 : i64} {
  func.func @edge_mlp_kernel(%arg0: i32, %arg1: memref<2x128xi32, #tpu.memory_space<vmem>>, %arg2: memref<3x128xf32, #tpu.memory_space<vmem>>, %arg3: memref<16x64xf32, #tpu.memory_space<vmem>>, %arg4: memref<16x3xf32, #tpu.memory_space<vmem>>, %arg5: memref<16x16xf32, #tpu.memory_space<vmem>>, %arg6: memref<4x16xf32, #tpu.memory_space<vmem>>, %arg7: memref<16x7xf32, #tpu.memory_space<vmem>>, %arg8: memref<4x128xf32, #tpu.memory_space<vmem>>) attributes {dimension_semantics = [#tpu.dimension_semantics<parallel>], iteration_bounds = array<i64: 2>, scalar_prefetch = 0 : i64, scratch_operands = 0 : i64, tpu.core_type = #tpu.core_type<tc>, window_params = [{transform_indices = @transform_0, window_bounds = array<i64: 2, 128>}, {transform_indices = @transform_1, window_bounds = array<i64: 3, 128>}, {pipeline_mode = #tpu.pipeline_mode<synchronous>, transform_indices = @transform_2, window_bounds = array<i64: 16, 64>}, {pipeline_mode = #tpu.pipeline_mode<synchronous>, transform_indices = @transform_3, window_bounds = array<i64: 16, 3>}, {pipeline_mode = #tpu.pipeline_mode<synchronous>, transform_indices = @transform_4, window_bounds = array<i64: 16, 16>}, {pipeline_mode = #tpu.pipeline_mode<synchronous>, transform_indices = @transform_5, window_bounds = array<i64: 4, 16>}, {pipeline_mode = #tpu.pipeline_mode<synchronous>, transform_indices = @transform_6, window_bounds = array<i64: 16, 7>}, {transform_indices = @transform_7, window_bounds = array<i64: 4, 128>}]} {
    %c0 = arith.constant 0 : index
    %c0_0 = arith.constant 0 : index
    %0 = vector.load %arg1[%c0, %c0_0] : memref<2x128xi32, #tpu.memory_space<vmem>>, vector<2x128xi32>
    %1 = vector.extract_strided_slice %0 {offsets = [0, 0], sizes = [1, 128], strides = [1, 1]} : vector<2x128xi32> to vector<1x128xi32>
    %2 = vector.extract_strided_slice %0 {offsets = [1, 0], sizes = [1, 128], strides = [1, 1]} : vector<2x128xi32> to vector<1x128xi32>
    %3 = tpu.iota {dimensions = array<i32: 0>} : vector<64x128xi32>
    %4 = vector.broadcast %1 : vector<1x128xi32> to vector<64x128xi32>
    %5 = arith.cmpi eq, %3, %4 : vector<64x128xi32>
    %c32_i32 = arith.constant 32 : i32
    %6 = vector.broadcast %c32_i32 : i32 to vector<64x128xi32>
    %7 = arith.subi %3, %6 : vector<64x128xi32>
    %8 = vector.broadcast %2 : vector<1x128xi32> to vector<64x128xi32>
    %9 = arith.cmpi eq, %7, %8 : vector<64x128xi32>
    %10 = arith.ori %5, %9 : vector<64x128xi1>
    %11 = arith.extui %10 : vector<64x128xi1> to vector<64x128xi32>
    %12 = arith.sitofp %11 : vector<64x128xi32> to vector<64x128xf32>
    %c0_1 = arith.constant 0 : index
    %c0_2 = arith.constant 0 : index
    %13 = vector.load %arg7[%c0_1, %c0_2] : memref<16x7xf32, #tpu.memory_space<vmem>>, vector<16x7xf32>
    %14 = vector.extract_strided_slice %13 {offsets = [0, 0], sizes = [16, 1], strides = [1, 1]} : vector<16x7xf32> to vector<16x1xf32>
    %15 = vector.extract_strided_slice %13 {offsets = [0, 1], sizes = [16, 1], strides = [1, 1]} : vector<16x7xf32> to vector<16x1xf32>
    %16 = vector.extract_strided_slice %13 {offsets = [0, 2], sizes = [16, 1], strides = [1, 1]} : vector<16x7xf32> to vector<16x1xf32>
    %17 = vector.extract_strided_slice %13 {offsets = [0, 3], sizes = [16, 1], strides = [1, 1]} : vector<16x7xf32> to vector<16x1xf32>
    %18 = vector.extract_strided_slice %13 {offsets = [0, 4], sizes = [16, 1], strides = [1, 1]} : vector<16x7xf32> to vector<16x1xf32>
    %19 = vector.extract_strided_slice %13 {offsets = [0, 5], sizes = [16, 1], strides = [1, 1]} : vector<16x7xf32> to vector<16x1xf32>
    %20 = vector.extract_strided_slice %13 {offsets = [0, 6], sizes = [4, 1], strides = [1, 1]} : vector<16x7xf32> to vector<4x1xf32>
    %c0_3 = arith.constant 0 : index
    %c0_4 = arith.constant 0 : index
    %21 = vector.load %arg3[%c0_3, %c0_4] : memref<16x64xf32, #tpu.memory_space<vmem>>, vector<16x64xf32>
    %cst = arith.constant dense<0.000000e+00> : vector<16x128xf32>
    %22 = tpu.matmul %21, %12, %cst {dimension_numbers = #tpu.dot_dimension_numbers<[1], [0], [0], [1], [0, 0, 1, 1], [], []>} : vector<16x64xf32>, vector<64x128xf32>, vector<16x128xf32> -> vector<16x128xf32>
    %c0_5 = arith.constant 0 : index
    %c0_6 = arith.constant 0 : index
    %23 = vector.load %arg4[%c0_5, %c0_6] : memref<16x3xf32, #tpu.memory_space<vmem>>, vector<16x3xf32>
    %c0_7 = arith.constant 0 : index
    %c0_8 = arith.constant 0 : index
    %24 = vector.load %arg2[%c0_7, %c0_8] : memref<3x128xf32, #tpu.memory_space<vmem>>, vector<3x128xf32>
    %cst_9 = arith.constant dense<0.000000e+00> : vector<16x128xf32>
    %25 = tpu.matmul %23, %24, %cst_9 {dimension_numbers = #tpu.dot_dimension_numbers<[1], [0], [0], [1], [0, 0, 1, 1], [], []>} : vector<16x3xf32>, vector<3x128xf32>, vector<16x128xf32> -> vector<16x128xf32>
    %26 = arith.addf %22, %25 : vector<16x128xf32>
    %27 = vector.broadcast %14 : vector<16x1xf32> to vector<16x128xf32>
    %28 = arith.addf %26, %27 : vector<16x128xf32>
    %cst_10 = arith.constant 0.000000e+00 : f32
    %29 = vector.broadcast %cst_10 : f32 to vector<16x128xf32>
    %30 = arith.maximumf %28, %29 : vector<16x128xf32>
    %cst_11 = arith.constant dense<0.000000e+00> : vector<128xf32>
    %31 = vector.multi_reduction <add>, %30, %cst_11 [0] : vector<16x128xf32> to vector<128xf32>
    %32 = vector.shape_cast %31 : vector<128xf32> to vector<1x128xf32>
    %cst_12 = arith.constant 1.600000e+01 : f32
    %33 = vector.broadcast %cst_12 : f32 to vector<1x128xf32>
    %34 = arith.divf %32, %33 : vector<1x128xf32>
    %35 = vector.broadcast %34 : vector<1x128xf32> to vector<16x128xf32>
    %36 = arith.subf %30, %35 : vector<16x128xf32>
    %37 = arith.mulf %36, %36 : vector<16x128xf32>
    %cst_13 = arith.constant dense<0.000000e+00> : vector<128xf32>
    %38 = vector.multi_reduction <add>, %37, %cst_13 [0] : vector<16x128xf32> to vector<128xf32>
    %39 = vector.shape_cast %38 : vector<128xf32> to vector<1x128xf32>
    %cst_14 = arith.constant 1.600000e+01 : f32
    %40 = vector.broadcast %cst_14 : f32 to vector<1x128xf32>
    %41 = arith.divf %39, %40 : vector<1x128xf32>
    %42 = vector.broadcast %34 : vector<1x128xf32> to vector<16x128xf32>
    %43 = arith.subf %30, %42 : vector<16x128xf32>
    %cst_15 = arith.constant 9.99999974E-6 : f32
    %44 = vector.broadcast %cst_15 : f32 to vector<1x128xf32>
    %45 = arith.addf %41, %44 : vector<1x128xf32>
    %46 = math.rsqrt %45 : vector<1x128xf32>
    %47 = vector.broadcast %46 : vector<1x128xf32> to vector<16x128xf32>
    %48 = arith.mulf %43, %47 : vector<16x128xf32>
    %49 = vector.broadcast %15 : vector<16x1xf32> to vector<16x128xf32>
    %50 = arith.mulf %48, %49 : vector<16x128xf32>
    %51 = vector.broadcast %16 : vector<16x1xf32> to vector<16x128xf32>
    %52 = arith.addf %50, %51 : vector<16x128xf32>
    %c0_16 = arith.constant 0 : index
    %c0_17 = arith.constant 0 : index
    %53 = vector.load %arg5[%c0_16, %c0_17] : memref<16x16xf32, #tpu.memory_space<vmem>>, vector<16x16xf32>
    %cst_18 = arith.constant dense<0.000000e+00> : vector<16x128xf32>
    %54 = tpu.matmul %53, %52, %cst_18 {dimension_numbers = #tpu.dot_dimension_numbers<[1], [0], [0], [1], [0, 0, 1, 1], [], []>} : vector<16x16xf32>, vector<16x128xf32>, vector<16x128xf32> -> vector<16x128xf32>
    %55 = vector.broadcast %17 : vector<16x1xf32> to vector<16x128xf32>
    %56 = arith.addf %54, %55 : vector<16x128xf32>
    %cst_19 = arith.constant 0.000000e+00 : f32
    %57 = vector.broadcast %cst_19 : f32 to vector<16x128xf32>
    %58 = arith.maximumf %56, %57 : vector<16x128xf32>
    %cst_20 = arith.constant dense<0.000000e+00> : vector<128xf32>
    %59 = vector.multi_reduction <add>, %58, %cst_20 [0] : vector<16x128xf32> to vector<128xf32>
    %60 = vector.shape_cast %59 : vector<128xf32> to vector<1x128xf32>
    %cst_21 = arith.constant 1.600000e+01 : f32
    %61 = vector.broadcast %cst_21 : f32 to vector<1x128xf32>
    %62 = arith.divf %60, %61 : vector<1x128xf32>
    %63 = vector.broadcast %62 : vector<1x128xf32> to vector<16x128xf32>
    %64 = arith.subf %58, %63 : vector<16x128xf32>
    %65 = arith.mulf %64, %64 : vector<16x128xf32>
    %cst_22 = arith.constant dense<0.000000e+00> : vector<128xf32>
    %66 = vector.multi_reduction <add>, %65, %cst_22 [0] : vector<16x128xf32> to vector<128xf32>
    %67 = vector.shape_cast %66 : vector<128xf32> to vector<1x128xf32>
    %cst_23 = arith.constant 1.600000e+01 : f32
    %68 = vector.broadcast %cst_23 : f32 to vector<1x128xf32>
    %69 = arith.divf %67, %68 : vector<1x128xf32>
    %70 = vector.broadcast %62 : vector<1x128xf32> to vector<16x128xf32>
    %71 = arith.subf %58, %70 : vector<16x128xf32>
    %cst_24 = arith.constant 9.99999974E-6 : f32
    %72 = vector.broadcast %cst_24 : f32 to vector<1x128xf32>
    %73 = arith.addf %69, %72 : vector<1x128xf32>
    %74 = math.rsqrt %73 : vector<1x128xf32>
    %75 = vector.broadcast %74 : vector<1x128xf32> to vector<16x128xf32>
    %76 = arith.mulf %71, %75 : vector<16x128xf32>
    %77 = vector.broadcast %18 : vector<16x1xf32> to vector<16x128xf32>
    %78 = arith.mulf %76, %77 : vector<16x128xf32>
    %79 = vector.broadcast %19 : vector<16x1xf32> to vector<16x128xf32>
    %80 = arith.addf %78, %79 : vector<16x128xf32>
    %c0_25 = arith.constant 0 : index
    %c0_26 = arith.constant 0 : index
    %81 = vector.load %arg6[%c0_25, %c0_26] : memref<4x16xf32, #tpu.memory_space<vmem>>, vector<4x16xf32>
    %cst_27 = arith.constant dense<0.000000e+00> : vector<4x128xf32>
    %82 = tpu.matmul %81, %80, %cst_27 {dimension_numbers = #tpu.dot_dimension_numbers<[1], [0], [0], [1], [0, 0, 1, 1], [], []>} : vector<4x16xf32>, vector<16x128xf32>, vector<4x128xf32> -> vector<4x128xf32>
    %83 = vector.broadcast %20 : vector<4x1xf32> to vector<4x128xf32>
    %84 = arith.addf %82, %83 : vector<4x128xf32>
    %c0_28 = arith.constant 0 : index
    %c0_29 = arith.constant 0 : index
    %85 = vector.load %arg8[%c0_28, %c0_29] : memref<4x128xf32, #tpu.memory_space<vmem>>, vector<4x128xf32>
    tpu.vector_store %arg8[%c0_28, %c0_29], %84 {strides = array<i32>} : memref<4x128xf32, #tpu.memory_space<vmem>>, vector<4x128xf32>,
    return
  }
  func.func @transform_0(%arg0: i32) -> (i32, i32) {
    %c0_i32 = arith.constant 0 : i32
    %c0_i32_0 = arith.constant 0 : i32
    return %c0_i32, %arg0 : i32, i32
  }
  func.func @transform_1(%arg0: i32) -> (i32, i32) {
    %c0_i32 = arith.constant 0 : i32
    %c0_i32_0 = arith.constant 0 : i32
    return %c0_i32, %arg0 : i32, i32
  }
  func.func @transform_2(%arg0: i32) -> (i32, i32) {
    %c0_i32 = arith.constant 0 : i32
    %c0_i32_0 = arith.constant 0 : i32
    %c0_i32_1 = arith.constant 0 : i32
    return %c0_i32, %c0_i32_0 : i32, i32
  }
  func.func @transform_3(%arg0: i32) -> (i32, i32) {
    %c0_i32 = arith.constant 0 : i32
    %c0_i32_0 = arith.constant 0 : i32
    %c0_i32_1 = arith.constant 0 : i32
    return %c0_i32, %c0_i32_0 : i32, i32
  }
  func.func @transform_4(%arg0: i32) -> (i32, i32) {
    %c0_i32 = arith.constant 0 : i32
    %c0_i32_0 = arith.constant 0 : i32
    %c0_i32_1 = arith.constant 0 : i32
    return %c0_i32, %c0_i32_0 : i32, i32
  }
  func.func @transform_5(%arg0: i32) -> (i32, i32) {
    %c0_i32 = arith.constant 0 : i32
    %c0_i32_0 = arith.constant 0 : i32
    %c0_i32_1 = arith.constant 0 : i32
    return %c0_i32, %c0_i32_0 : i32, i32
  }
  func.func @transform_6(%arg0: i32) -> (i32, i32) {
    %c0_i32 = arith.constant 0 : i32
    %c0_i32_0 = arith.constant 0 : i32
    %c0_i32_1 = arith.constant 0 : i32
    return %c0_i32, %c0_i32_0 : i32, i32
  }
  func.func @transform_7(%arg0: i32) -> (i32, i32) {
    %c0_i32 = arith.constant 0 : i32
    %c0_i32_0 = arith.constant 0 : i32
    return %c0_i32, %arg0 : i32, i32
  }
}

</mosaic_0001>

<bundles_post_ra>
// kernel: tpu_custom_call.1
= control target key start
LH: loop header
LB: loop body
LE: loop exit
PB: predicated region body
PF: predicated region fallthrough
CT: control target
= control target key end

     0   :  { %12 = vsyncpa [#allocation3], 0  ;;  %s1205_s0 = inlined_call_operand.vmem [shape: s32[2,200], index: 0, kind: input, shape index: {}]   ;;  %s1206_s1 = inlined_call_operand.hbm [shape: f32[3,200], index: 1, kind: input, shape index: {}]   ;;  %s1207_s2 = inlined_call_operand.vmem [shape: f32[16,64], index: 2, kind: input, shape index: {}]   ;;  %s1208_s3 = inlined_call_operand.vmem [shape: f32[16,3], index: 3, kind: input, shape index: {}]   ;;  %s1209_s4 = inlined_call_operand.vmem [shape: f32[16,16], index: 4, kind: input, shape index: {}]   ;;  %s1210_s5 = inlined_call_operand.vmem [shape: f32[4,16], index: 5, kind: input, shape index: {}]   ;;  %s1211_s6 = inlined_call_operand.vmem [shape: f32[16,7], index: 6, kind: input, shape index: {}]   ;;  %s1212_s7 = inlined_call_operand.hbm [shape: f32[4,200], index: 7, kind: output, shape index: {}]  }
   0x1   :  { %14 = vsyncpa [#allocation3 + $0x1], 0 }
   0x2   :  { %15 = vsyncpa [#allocation4], 0 }
   0x3   :  { %17 = vsyncpa [#allocation4 + $0x1], 0  ;;  %s1002_s24 = smov 0   ;;  %s1004_s25 = smov 0  }
   0x4   :  { %s1006_s26 = smov 0   ;;  %s1008_s27 = smov 0  }
   0x5 LB: > { %s1023_s28 = sadd.s32 4294967295, %s951_s27   ;;  %s739_s29 = sadd.s32 4294967294, %s951_s27   ;;  %s951_s27 = sphi %s1008_s27, %s1224_s27   ;;  %s947_s26 = sphi %s1006_s26, %s1223_s26   ;;  %s943_s25 = sphi %s1004_s25, %s1222_s25   ;;  %s939_s24 = sphi %s1002_s24, %s1221_s24  }
   0x6   : > { %s1027_s30 = sadd.s32 1, %s951_s27   ;;  %s56_s8 = sadd.s32 1, %s947_s26 }
   0x7   : > { %s53_s9 = ssub.s32 %s951_s27, %s1027_s30  ;;  %p63_p0 = scmp.ne.s32.totalorder %s947_s26, %s943_s25 }
   0x8   : > { %p54_p1 = scmp.eq.s32.totalorder %s53_s9, 0  ;;  %p64_p2 = scmp.eq.s32.totalorder %s951_s27, 0 }
   0x9   : > { %p69_p3 = scmp.ne.s32.totalorder %s943_s25, %s939_s24  ;;  %p70_p4 = scmp.eq.s32.totalorder %s1023_s28, 0 }
   0xa   : > { %s1039_s10 = scalar_select %p54_p1, %s947_s26, %s56_s8  }
   0xb   : > { %p1041_p5 = por %p64_p2, %p63_p0  ;;  %p1045_p6 = por %p70_p4, %p69_p3 }
   0xc   : > { %1213 = sst [smem:[#allocation8_spill]] %s1039_s10  ;;  %p198_p7 = scmp.eq.s32.totalorder %s1023_s28, 1 }
   0xd   : > { %p204_p8 = scmp.eq.s32.totalorder %s739_s29, 1  ;;  %p795_p10 = scmp.lt.s32.totalorder %s951_s27, 2 }
   0xe   : > { %p1052_p11 = por %p198_p7, %p63_p0  ;;  %s246_s15 = sand.u32 1, %s947_s26  }
   0xf   : > { %p1056_p12 = por %p204_p8, %p69_p3  ;;  %s743_s16 = sshll.u32 %s951_s27, 2 }
  0x10   : > { %s742_s17 = sshll.u32 %s246_s15, 2  ;;  %s254_s20 = scalar_lea.hbm %s1206_s1, %s743_s16 }
  0x11   : > { %s256_s21 = sshll.u32 %s254_s20, 4  ;;  %s250_s22 = scalar_lea.vmem [#allocation2], %s742_s17  ;;  %s257_s21 = int_to_ptr.hbm [resolvable:$true] %s256_s21 }
  0x12   : > { %s258_s23 = sshll.u32 %s250_s22, 4  ;;  %p1067_p13 = pnand %p795_p10, %p1041_p5  ;;  %s259_s23 = int_to_ptr.vmem [resolvable:$true] %s258_s23 }
  0x13   : > { %p744_p0 = scmp.ge.s32.totalorder %s951_s27, 1  ;;  %p263_p1 = scmp.lt.s32.totalorder %s951_s27, 3 }
  0x14   : > { %s247_s8 = scalar_lea.sflag [#allocation3], %s246_s15  ;;  %s855_s9 = sshra.s32 %s257_s21, 4  ;;  %s856_s9 = int_to_ptr.hbm [resolvable:$true] %s855_s9 }
  0x15   : > { %s857_s10 = scalar_lea.hbm %s856_s9, 4  ;;  %p859_p3 = pneg %p1067_p13 }
  0x16   : > { %p858_p2 = scmp.ne.s32.totalorder %s856_s9, %s857_s10  ;;  %s862_s11 = scalar_lea.hbm %s1206_s1, 8 }
  0x17   : > { %p863_p5 = scmp.lt.s32.totalorder %s856_s9, %s1206_s1  ;;  %p864_p8 = scmp.lt.s32.totalorder %s862_s11, %s857_s10 }
  0x18   : > { %p860_p4 = pnand %p859_p3, %p858_p2 }
  0x19   : > { %p865_p10 = por %p864_p8, %p863_p5 }
  0x1a   : > { %p861_p7 = pneg %p860_p4 }
  0x1c   : > { %p866_p9 = pnand %p865_p10, %p861_p7 }
  0x1e   : > { %869 = shalt.err (!%p866_p9)
}
  0x1f   : > { %790 = dma.hbm_to_vmem [thread:$0]  (!%p1067_p13), %s257_s21, 64, %s259_s23, %s247_s8  }
  0x20   : > { %p264_p2 = pnand %p744_p0, %p263_p1 }
  0x21   : > { %s1088_s15 = sand.u32 (!%p264_p2), 1, %s943_s25  }
  0x22   : > { %267 = sbr.rel (%p264_p2) target bundleno = 617 (0x269), region = 48  ;;  %s745_s10 = sshll.u32 (!%p264_p2), %s1088_s15, 2 }
  0x23   : > { %s270_s20 = scalar_lea.sflag (!%p264_p2), [#allocation3], %s1088_s15  ;;  %s273_s22 = scalar_lea.vmem (!%p264_p2), [#allocation2], %s745_s10 }
  0x27   : > { %930 = dma.done.wait (%p1045_p6), %s270_s20, 64  }
  0x28   : > { %932 = vsyncadd (%p1045_p6), %s270_s20, 4294967232  ;;  %p309_p9 = scmp.lt.s32.totalorder %s1023_s28, 1  ;;  %v314_v0 = vlaneseq  ;;  %v953_v2 = vmov 0   ;;  %v954_v6 = vmov 1   ;;  %v955_v7 = vmov 2   ;;  %v376_v14 = vld [vmem:[%s1208_s3] sm:$0xff] }
  0x29   : > { %838 = vset.pattern.permute.xlu0 %v953_v2  ;;  %839 = vset.pattern.permute.xlu1 %v954_v6  ;;  %vm386_vm0 = vcmask 1042432   ;;  %vm379_vm1 = vcmask 23552   ;;  %v378_v18 = vld [vmem:[%s273_s22] sm:$0x7]  ;;  %v1125_v22 = vld [vmem:[%s1211_s6 + $0x8] sm:$0xff]  ;;  %v956_v23 = vmov 1.0  }
  0x2a   : > { %s310_s21 = scalar_select %p309_p9, %s1023_s28, 1  ;;  %v1100_v1 = vshrl.u32 %v314_v0, 7  ;;  %840 = vset.pattern.permute.xlu2 %v955_v7  ;;  %v1117_v19 = vld [vmem:[%s1211_s6] sm:$0xff]  ;;  %763 = vmatpush.msk.msra.mxu0 %vm386_vm0, %v378_v18  ;;  %v377_v26 = vld [vmem:[%s1208_s3 + $0x8] sm:$0xff]  ;;  %v957_v33 = vmov 16.0   ;;  %v958_v6 = vmov 3  }
  0x2b   : > { %445 = vperm.xlu0 %838, %v1117_v19   ;;  %764 = vmatmul.msk.f32.vlgmr.msra.gmra.mxu0 %vm379_vm1, %v376_v14  ;;  %v374_v28 = vld [vmem:[%s1207_s2] sm:$0xff]  ;;  %v375_v29 = vld [vmem:[%s1207_s2 + $0x8] sm:$0xff]  ;;  %849 = vrcp.f32 %v957_v33  ;;  %s780_s19 = sshll.u32 %s1023_s28, 2  ;;  %s905_s11 = scalar_lea.hbm %s1212_s7, 8 }
  0x2c   : > { %s747_s23 = sshll.u32 %s310_s21, 1  ;;  %v322_v3 = vadd.s32 56, %v1100_v1  ;;  %v321_v4 = vadd.s32 48, %v1100_v1  ;;  %v320_v5 = vadd.s32 40, %v1100_v1  ;;  %v318_v8 = vadd.s32 24, %v1100_v1  ;;  %502 = vperm.xlu1 %839, %v1125_v22   ;;  %512 = vperm.xlu2 %840, %v1125_v22   ;;  %s652_s21 = scalar_lea.hbm %s1212_s7, %s780_s19 }
  0x2d   : > { %s312_s8 = scalar_lea.vmem %s1205_s0, %s747_s23  ;;  %v319_v13 = vadd.s32 32, %v1100_v1  ;;  %v317_v17 = vadd.s32 16, %v1100_v1  ;;  %v316_v21 = vadd.s32 8, %v1100_v1  ;;  %v748_v27 = vadd.s32 4294967264, %v1100_v1  ;;  %s308_s23 = scalar_lea.vmem [#allocation5], %s745_s10 }
  0x2e   : > { %v754_v9 = vadd.s32 4294967264, %v322_v3  ;;  %v753_v10 = vadd.s32 4294967264, %v321_v4  ;;  %v313_v11 = vld [vmem:[%s312_s8] sm:$0x3]  ;;  %v752_v12 = vadd.s32 4294967264, %v320_v5  ;;  %v751_v20 = vadd.s32 4294967264, %v318_v8 }
  0x2f   : > { %v323_v15 = vperm.slane %v313_v11, 0  ;;  %v339_v16 = vperm.slane %v313_v11, 1  ;;  %v750_v24 = vadd.s32 4294967264, %v317_v17  ;;  %v749_v25 = vadd.s32 4294967264, %v316_v21  ;;  %s654_s12 = sshll.u32 %s308_s23, 4  ;;  %s656_s29 = sshll.u32 %s652_s21, 4  ;;  %s655_s12 = int_to_ptr.vmem [resolvable:$true] %s654_s12  ;;  %s657_s29 = int_to_ptr.hbm [resolvable:$true] %s656_s29 }
  0x30   : > { %s642_s8 = scalar_lea.sflag [#allocation4], %s1088_s15  ;;  %s899_s9 = sshra.s32 %s657_s29, 4  ;;  %s900_s9 = int_to_ptr.hbm [resolvable:$true] %s899_s9 }
  0x31   : > { %vm331_vm2 = vcmp.eq.s32.totalorder %v322_v3, %v323_v15  ;;  %vm347_vm3 = vcmp.eq.s32.totalorder %v754_v9, %v339_v16  ;;  %vm330_vm4 = vcmp.eq.s32.totalorder %v321_v4, %v323_v15  ;;  %vm346_vm5 = vcmp.eq.s32.totalorder %v753_v10, %v339_v16  ;;  %v850_v36 = vpop.eup %849  ;;  %s901_s16 = scalar_lea.hbm %s900_s9, 4  ;;  %p906_p1 = scmp.lt.s32.totalorder %s900_s9, %s1212_s7 }
  0x32   : > { %vm355_vm6 = vmor %vm331_vm2, %vm347_vm3  ;;  %vm329_vm7 = vcmp.eq.s32.totalorder %v320_v5, %v323_v15  ;;  %vm345_vm8 = vcmp.eq.s32.totalorder %v752_v12, %v339_v16  ;;  %vm328_vm10 = vcmp.eq.s32.totalorder %v319_v13, %v323_v15  ;;  %vm344_vm11 = vcmp.eq.s32.totalorder %v1100_v1, %v339_v16  ;;  %p902_p6 = scmp.ne.s32.totalorder %s900_s9, %s901_s16  ;;  %p907_p3 = scmp.lt.s32.totalorder %s905_s11, %s901_s16 }
  0x33   : > { %766 = vmatpush.msk.msra.mxu1 %vm355_vm6, %v956_v23  ;;  %vm354_vm9 = vmor %vm330_vm4, %vm346_vm5  ;;  %vm327_vm13 = vcmp.eq.s32.totalorder %v318_v8, %v323_v15  ;;  %vm343_vm14 = vcmp.eq.s32.totalorder %v751_v20, %v339_v16  ;;  %vm326_vm0 = vcmp.eq.s32.totalorder %v317_v17, %v323_v15  ;;  %vm342_vm2 = vcmp.eq.s32.totalorder %v750_v24, %v339_v16 }
  0x34   : > { %vm353_vm12 = vmor %vm329_vm7, %vm345_vm8  ;;  %450 = vperm.xlu0 %838, %v1125_v22   ;;  %vm325_vm4 = vcmp.eq.s32.totalorder %v316_v21, %v323_v15  ;;  %vm341_vm5 = vcmp.eq.s32.totalorder %v749_v25, %v339_v16  ;;  %765 = vmatmul.msk.f32.gmra.mxu0 %vm379_vm1, %v377_v26  ;;  %vm324_vm7 = vcmp.eq.s32.totalorder %v1100_v1, %v323_v15  ;;  %v465_v41 = vmul.f32 16.0, %v850_v36  ;;  %p903_p13 = pnand %p902_p6, %p1052_p11  ;;  %p908_p4 = por %p907_p3, %p906_p1 }
  0x35   : > { %767 = vmatpush.msk.msra.mxu1 %vm354_vm9, %v956_v23  ;;  %vm352_vm15 = vmor %vm328_vm10, %vm344_vm11  ;;  %498 = vperm.xlu1 %839, %v1117_v19   ;;  %vm340_vm8 = vcmp.eq.s32.totalorder %v748_v27, %v339_v16  ;;  %vm413_vm11 = vcmask 523264   ;;  %vm469_vm1 = vweird.f32 %v850_v36  ;;  %v959_v8 = vmov 4  }
  0x36   : > { %vm351_vm3 = vmor %vm327_vm13, %vm343_vm14  ;;  %508 = vperm.xlu2 %840, %v1117_v19   ;;  %v466_v45 = vsub.f32 1.0, %v465_v41  ;;  %v960_v15 = vmov 5   ;;  %p904_p0 = pneg %p903_p13 }
  0x37   : > { %768 = vmatpush.msk.msra.mxu1 %vm353_vm12, %v956_v23  ;;  %vm350_vm6 = vmor %vm326_vm0, %vm342_vm2 }
  0x38   : > { %vm349_vm9 = vmor %vm325_vm4, %vm341_vm5  ;;  %v467_v48 = vmul.f32 %v850_v36, %v466_v45  ;;  %p909_p7 = pnand %p908_p4, %p904_p0 }
  0x39   : > { %769 = vmatpush.msk.msra.mxu1 %vm352_vm15, %v956_v23  ;;  %vm348_vm10 = vmor %vm324_vm7, %vm340_vm8  ;;  %vm527_vm15 = vcmask 130048  }
  0x3a   : > { %v468_v51 = vadd.f32 %v850_v36, %v467_v48 }
  0x3b   : > { %770 = vmatpush.msk.msra.mxu1 %vm351_vm3, %v956_v23 }
  0x3c   : > { %v1145_v54 = vsel %vm469_vm1, %v850_v36, %v468_v51  ;;  %841 = vset.pattern.permute.xlu0 %v958_v6 }
  0x3d   : > { %771 = vmatpush.msk.msra.mxu1 %vm350_vm6, %v956_v23  ;;  %842 = vset.pattern.permute.xlu1 %v958_v6 }
  0x3e   : > { %520 = vperm.xlu0 %841, %v1117_v19   ;;  %524 = vperm.xlu1 %842, %v1125_v22  }
  0x3f   : > { %772 = vmatpush.msk.msra.mxu1 %vm349_vm9, %v956_v23  ;;  %843 = vset.pattern.permute.xlu2 %v959_v8 }
  0x40   : > { %597 = vperm.xlu2 %843, %v1125_v22  }
  0x41   : > { %773 = vmatpush.msk.msra.mxu1 %vm348_vm10, %v956_v23 }
  0x42   : > { %774 = vmatmul.msk.f32.vlgmr.msra.gmra.mxu1 %vm413_vm11, %v374_v28  ;;  %v517_v28 = vld [vmem:[%s1209_s4] sm:$0xff] }
  0x46   : > { %844 = vset.pattern.permute.xlu1 %v959_v8  ;;  %846 = vset.pattern.permute.xlu0 %v960_v15 }
  0x47   : > { %593 = vperm.xlu1 %844, %v1117_v19   ;;  %603 = vperm.xlu0 %846, %v1117_v19  }
  0x48   : > { %845 = vset.pattern.permute.xlu2 %v960_v15 }
  0x49   : > { %607 = vperm.xlu2 %845, %v1125_v22   ;;  %v518_v22 = vld [vmem:[%s1209_s4 + $0x8] sm:$0xff] }
  0x4a   : > { %775 = vmatmul.msk.f32.gmra.mxu1 %vm413_vm11, %v375_v29 }
  0x86   : > { %v513_v14 = vpop.permute.xlu2 %512 }
  0x90   : > { %v509_v26 = vpop.permute.xlu2 %508 }
  0x9d   : > { %v446_v31 = vpop.permute.xlu0 %445 }
  0x9e   : > { %v503_v10 = vpop.permute.xlu1 %502 }
  0xa6   : > { %v451_v40 = vpop.permute.xlu0 %450 }
  0xa7   : > { %v499_v21 = vpop.permute.xlu1 %498 }
  0xa8   : > { %v407_v30 = vpop.f32.mrf.mxu0 }
  0xb1   : > { %v410_v35 = vpop.f32.mrf.mxu0 }
  0xbf   : > { %v437_v32 = vpop.f32.mrf.mxu1 }
  0xc0   : > { %v438_v34 = vadd.f32 %v437_v32, %v407_v30  ;;  %v521_v30 = vpop.permute.xlu0 %520 }
  0xc2   : > { %v453_v38 = vadd.f32 %v446_v31, %v438_v34  ;;  %v525_v31 = vpop.permute.xlu1 %524 }
  0xc4   : > { %v455_v43 = vmax.f32 %v453_v38, 0.0 }
  0xc7   : > { %v440_v37 = vpop.f32.mrf.mxu1 }
  0xc8   : > { %v441_v39 = vadd.f32 %v440_v37, %v410_v35  ;;  %v604_v8 = vpop.permute.xlu0 %603 }
  0xca   : > { %v454_v42 = vadd.f32 %v451_v40, %v441_v39 }
  0xcc   : > { %v456_v44 = vmax.f32 %v454_v42, 0.0 }
  0xce   : > { %v457_v46 = vadd.f32 %v456_v44, %v455_v43 }
  0xd0   : > { %v458_v47 = vrot.slane %v457_v46, 4 }
  0xd2   : > { %v459_v49 = vadd.f32 %v458_v47, %v457_v46 }
  0xd4   : > { %v460_v50 = vrot.slane %v459_v49, 2 }
  0xd6   : > { %v461_v52 = vadd.f32 %v460_v50, %v459_v49 }
  0xd8   : > { %v462_v53 = vrot.slane %v461_v52, 1 }
  0xda   : > { %v463_v55 = vadd.f32 %v462_v53, %v461_v52 }
  0xdc   : > { %v471_v56 = vmul.f32 %v1145_v54, %v463_v55 }
  0xde   : > { %v472_v57 = vsub.f32 %v455_v43, %v471_v56  ;;  %v473_v58 = vsub.f32 %v456_v44, %v471_v56 }
  0xe0   : > { %v474_v59 = vmul.f32 %v472_v57, %v472_v57  ;;  %v475_v60 = vmul.f32 %v473_v58, %v473_v58 }
  0xe2   : > { %v476_v61 = vadd.f32 %v475_v60, %v474_v59 }
  0xe4   : > { %v477_v62 = vrot.slane %v476_v61, 4 }
  0xe6   : > { %v478_v63 = vadd.f32 %v477_v62, %v476_v61  ;;  %v598_v62 = vpop.permute.xlu2 %597 }
  0xe8   : > { %v479_v0 = vrot.slane %v478_v63, 2 }
  0xea   : > { %v480_v1 = vadd.f32 %v479_v0, %v478_v63 }
  0xec   : > { %v481_v2 = vrot.slane %v480_v1, 1 }
  0xee   : > { %v482_v3 = vadd.f32 %v481_v2, %v480_v1  ;;  %v608_v6 = vpop.permute.xlu2 %607 }
  0xf0   : > { %v483_v4 = vmul.f32 %v482_v3, %v1145_v54 }
  0xf2   : > { %v484_v5 = vadd.f32 1e-05, %v483_v4 }
  0xf4   : > { %851 = vrsqrt.f32 %v484_v5  ;;  %vm491_vm13 = vweird.f32 %v484_v5 }
  0xfa   : > { %v852_v7 = vpop.eup %851 }
  0xfb   : > { %v486_v9 = vmul.f32 %v852_v7, %v484_v5  ;;  %vm492_vm12 = vweird.f32 %v852_v7 }
  0xfc   : > { %vm493_vm14 = vmor %vm491_vm13, %vm492_vm12 }
  0xfd   : > { %v487_v11 = vmul.f32 %v852_v7, %v486_v9 }
  0xff   : > { %v488_v12 = vmul.f32 0.5, %v487_v11  ;;  %v612_v11 = vld [vmem:[%s1210_s5] sm:$0xf] }
 0x101   : > { %v489_v13 = vsub.f32 1.5, %v488_v12 }
 0x103   : > { %v490_v16 = vmul.f32 %v852_v7, %v489_v13 }
 0x105   : > { %v494_v17 = vsel %vm493_vm14, %v852_v7, %v490_v16 }
 0x106   : > { %v496_v18 = vmul.f32 %v494_v17, %v473_v58  ;;  %v495_v20 = vmul.f32 %v494_v17, %v472_v57  ;;  %v961_v58 = vmov 6  }
 0x107   : > { %847 = vset.pattern.permute.xlu1 %v961_v58  ;;  %848 = vset.pattern.permute.xlu0 %v961_v58 }
 0x108   : > { %v506_v23 = vmul.f32 %v503_v10, %v496_v18  ;;  %v505_v24 = vmul.f32 %v499_v21, %v495_v20  ;;  %614 = vperm.xlu1 %847, %v1117_v19  }
 0x10a   : > { %v516_v25 = vadd.f32 %v513_v14, %v506_v23  ;;  %v515_v27 = vadd.f32 %v509_v26, %v505_v24 }
 0x10c   : > { %548 = vmatpush.msra.mxu2 %v516_v25 }
 0x10e   : > { %549 = vmatpush.msra.mxu2 %v515_v27 }
 0x10f   : > { %776 = vmatmul.msk.f32.vlgmr.msra.gmra.mxu2 %vm527_vm15, %v517_v28 }
 0x117   : > { %777 = vmatmul.msk.f32.gmra.mxu2 %vm527_vm15, %v518_v22 }
 0x192   : > { %v551_v29 = vpop.f32.mrf.mxu2 }
 0x193   : > { %v552_v32 = vadd.f32 %v551_v29, %v521_v30 }
 0x195   : > { %v557_v35 = vmax.f32 %v552_v32, 0.0 }
 0x19a   : > { %v554_v33 = vpop.f32.mrf.mxu2 }
 0x19b   : > { %v555_v34 = vadd.f32 %v554_v33, %v525_v31 }
 0x19d   : > { %v558_v36 = vmax.f32 %v555_v34, 0.0 }
 0x19f   : > { %v559_v37 = vadd.f32 %v558_v36, %v557_v35 }
 0x1a1   : > { %v560_v38 = vrot.slane %v559_v37, 4 }
 0x1a3   : > { %v561_v39 = vadd.f32 %v560_v38, %v559_v37 }
 0x1a5   : > { %v562_v40 = vrot.slane %v561_v39, 2 }
 0x1a7   : > { %v563_v41 = vadd.f32 %v562_v40, %v561_v39 }
 0x1a9   : > { %v564_v42 = vrot.slane %v563_v41, 1 }
 0x1ab   : > { %v565_v43 = vadd.f32 %v564_v42, %v563_v41 }
 0x1ad   : > { %v566_v44 = vmul.f32 %v565_v43, %v1145_v54 }
 0x1af   : > { %v567_v45 = vsub.f32 %v557_v35, %v566_v44  ;;  %v568_v46 = vsub.f32 %v558_v36, %v566_v44 }
 0x1b1   : > { %v569_v47 = vmul.f32 %v567_v45, %v567_v45  ;;  %v570_v48 = vmul.f32 %v568_v46, %v568_v46 }
 0x1b3   : > { %v571_v49 = vadd.f32 %v570_v48, %v569_v47 }
 0x1b5   : > { %v572_v50 = vrot.slane %v571_v49, 4 }
 0x1b7   : > { %v573_v51 = vadd.f32 %v572_v50, %v571_v49 }
 0x1b9   : > { %v574_v52 = vrot.slane %v573_v51, 2 }
 0x1bb   : > { %v575_v53 = vadd.f32 %v574_v52, %v573_v51 }
 0x1bd   : > { %v576_v55 = vrot.slane %v575_v53, 1 }
 0x1bf   : > { %v577_v56 = vadd.f32 %v576_v55, %v575_v53 }
 0x1c1   : > { %v578_v57 = vmul.f32 %v577_v56, %v1145_v54  ;;  %v594_v54 = vpop.permute.xlu1 %593 }
 0x1c3   : > { %v579_v59 = vadd.f32 1e-05, %v578_v57 }
 0x1c5   : > { %853 = vrsqrt.f32 %v579_v59  ;;  %vm586_vm2 = vweird.f32 %v579_v59 }
 0x1c9   : > { %v615_v12 = vpop.permute.xlu1 %614 }
 0x1cb   : > { %v854_v60 = vpop.eup %853 }
 0x1cc   : > { %v581_v61 = vmul.f32 %v854_v60, %v579_v59  ;;  %vm587_vm0 = vweird.f32 %v854_v60 }
 0x1cd   : > { %vm588_vm3 = vmor %vm586_vm2, %vm587_vm0 }
 0x1ce   : > { %v582_v63 = vmul.f32 %v854_v60, %v581_v61 }
 0x1d0   : > { %v583_v0 = vmul.f32 0.5, %v582_v63 }
 0x1d2   : > { %v584_v1 = vsub.f32 1.5, %v583_v0 }
 0x1d4   : > { %v585_v2 = vmul.f32 %v854_v60, %v584_v1 }
 0x1d6   : > { %v589_v3 = vsel %vm588_vm3, %v854_v60, %v585_v2 }
 0x1d7   : > { %v591_v4 = vmul.f32 %v589_v3, %v568_v46  ;;  %v590_v5 = vmul.f32 %v589_v3, %v567_v45 }
 0x1d9   : > { %v601_v19 = vmul.f32 %v598_v62, %v591_v4  ;;  %v600_v7 = vmul.f32 %v594_v54, %v590_v5 }
 0x1db   : > { %v611_v9 = vadd.f32 %v608_v6, %v601_v19  ;;  %v610_v10 = vadd.f32 %v604_v8, %v600_v7 }
 0x1dd   : > { %634 = vmatpush.msra.mxu3 %v611_v9 }
 0x1df   : > { %635 = vmatpush.msra.mxu3 %v610_v10 }
 0x1e0   : > { %778 = vmatmul.msk.f32.vlgmr.msra.gmra.mxu3 %vm527_vm15, %v612_v11 }
 0x263   : > { %v637_v13 = vpop.f32.mrf.mxu3 }
 0x264   : > { %v638_v14 = vadd.f32 %v637_v13, %v615_v12 }
 0x266   : > { %640 = vst [vmem:[%s308_s23] sm:$0xf] %v638_v14 }
 0x267   : > { %912 = shalt.err (!%p909_p7)
}
 0x268   : > { %785 = dma.vmem_to_hbm [thread:$0]  (%p1052_p11), %s655_s12, 64, %s657_s29, %s642_s8  }
 0x269 PF: > { %s668_s15 = sand.u32 1, %s939_s24   ;;  %p1219_p5 = scmp.ge.s32.totalorder %s951_s27, 2 }
 0x26a   : > { %s669_s19 = scalar_lea.sflag [#allocation4], %s668_s15 }
 0x26b   : > { %p792_p8 = pnand %p1219_p5, %p1056_p12 }
 0x26d   : > { %p793_p10 = pneg %p792_p8 }
 0x26f   : > { %934 = dma.done.wait (%p793_p10), %s669_s19, 64  }
 0x270   : > { %936 = vsyncadd (%p793_p10), %s669_s19, 4294967232  ;;  %s1220_s20 = sld [smem:[#allocation8_spill]]  ;;  %p20_p2 = scmp.ge.s32.totalorder %s1027_s30, 4  }
 0x271   : > { %s1221_s24 = smov %s943_s25  ;;  %s1222_s25 = smov %s947_s26 }
 0x272   : > { %s1224_s27 = smov %s1027_s30  ;;  %22 = sbr.rel (!%p20_p2) target bundleno = 5 (0x5), region = 96 }
 0x276   : > { %s1223_s26 = smov %s1220_s20 }
 0x277   :  { %675 = vsyncpa [#allocation3], 1 }
 0x278   :  { %677 = vsyncpa [#allocation3 + $0x1], 1 }
 0x279   :  { %678 = vsyncpa [#allocation4], 1 }
 0x27a   :  { %680 = vsyncpa [#allocation4 + $0x1], 1 }

</bundles_post_ra>
